<compile_context>
chip_gen: v7x
topology: tpu7x:2x2x1
jax: 0.10.0
libtpu: 0.0.40
codegen_flags: <defaults>
</compile_context>

<pallas_src>
import jax
import jax.numpy as jnp
from jax.experimental import pallas as pl
from jax.experimental.pallas import tpu as pltpu


def _round_up(n, m):
    return ((n + m - 1) // m) * m


def _num_tensorcores():
    """Best-effort count of TensorCores per chip (2 on v7x, else 1)."""
    try:
        kind = jax.devices()[0].device_kind.lower()
        if "v7" in kind:
            return 2
    except Exception:
        pass
    return 1


# ----------------------------------------------------------------------------
# Kernel
# ----------------------------------------------------------------------------
# Slab layout (bf16, shape [7, P, P]; P = 128 for hidden=32, d0=d1=16):
#   panel 0 : W_in   [din, H]  zero-padded to [P, P]
#   panel 1 : W11    [H, H]    zero-padded
#   panel 2 : W12
#   panel 3 : W21
#   panel 4 : W22
#   panel 5 : W_out  [H, d0]   zero-padded
#   panel 6 : rows 0..3 = b11, b12, b21, b22 (each zero-padded to P lanes)
# Weights are stored pre-transposed ([in, out]) so the kernel computes
# activation @ W, matching PyTorch nn.Linear semantics.

def t_neuralnet_kernel(xy_ref, w_ref, o_ref):
    bf16, f32 = jnp.bfloat16, jnp.float32

    a = xy_ref[...]                                    # (tb, P) bf16
    # Preload all four bias rows once (one lane-dense tile read).
    b_all = w_ref[6, 0:16, :].astype(f32)              # rows 0..3 are biases

    # X = layer_input(concat(x, y)) -- one MXU pass, no bias.
    X = jnp.dot(a, w_ref[0], preferred_element_type=f32)

    def hidden_layer(h, idx):
        z = jnp.dot(h.astype(bf16), w_ref[idx + 1], preferred_element_type=f32)
        z = z + b_all[idx:idx + 1, :]
        return jnp.maximum(z, 0.0)

    h = hidden_layer(X, 0)            # relu(layer11(X))
    h = hidden_layer(h, 1) + X        # relu(layer12(.)) + X
    h = hidden_layer(h, 2)            # relu(layer21(.))
    h = hidden_layer(h, 3) + X        # relu(layer22(.)) + X

    # layer_out (no bias) -- lane-dense (tb, P) store; wrapper slices [:, :d0].
    o_ref[...] = jnp.dot(h.astype(bf16), w_ref[5],
                         preferred_element_type=f32).astype(o_ref.dtype)


# ----------------------------------------------------------------------------
# Wrapper
# ----------------------------------------------------------------------------
def _choose_batch_tile(B, n_cores, max_tile=2048):
    tb = pl.cdiv(B, n_cores)          # one block per TensorCore when possible
    tb = min(tb, max_tile)            # cap so huge batches still tile (VMEM)
    return max(8, _round_up(tb, 8))   # sublane-aligned


def t_neuralnet_forward(x, y, w_slab, *, d0, d1, max_tile=2048):
    """x: [B, d0] f32, y: [B, d1] f32, w_slab: [7, P, P] bf16 packed params."""
    B = x.shape[0]
    n_panels, P, _ = w_slab.shape
    din = d0 + d1

    n_cores = _num_tensorcores()
    tb = _choose_batch_tile(B, n_cores, max_tile)
    B_pad = _round_up(B, tb)
    grid = (B_pad // tb,)

    # Pack (and zero-pad) the inputs into a single lane-dense bf16 array:
    # lanes 0:d0 = x, d0:din = y, din:P = 0; rows B:B_pad = 0.
    xy = jnp.zeros((B_pad, P), jnp.bfloat16)
    xy = xy.at[:B, :d0].set(x.astype(jnp.bfloat16))
    xy = xy.at[:B, d0:din].set(y.astype(jnp.bfloat16))

    out = pl.pallas_call(
        t_neuralnet_kernel,
        out_shape=jax.ShapeDtypeStruct((B_pad, P), jnp.float32),
        grid=grid,
        in_specs=[
            pl.BlockSpec((tb, P), lambda i: (i, 0)),
            # Constant index map -> weight slab stays resident in VMEM.
            # (pl.Buffered(1) would shave per-step bookkeeping, but
            # double-buffering ~230 KB is harmless; left at default.)
            pl.BlockSpec((n_panels, P, P), lambda i: (0, 0, 0)),
        ],
        out_specs=pl.BlockSpec((tb, P), lambda i: (i, 0)),
        compiler_params=pltpu.CompilerParams(
            dimension_semantics=("parallel",)),
    )(xy, w_slab)

    return out[:B, :d0]


# ----------------------------------------------------------------------------
# Parameter construction / packing
# ----------------------------------------------------------------------------
def init_params(key, d0, d1, hidden):
    """Deterministic init matching the PyTorch module's used layers.

    nn.Linear(in, out).weight is [out, in]; we store the transpose [in, out].
    layer31 / layer32 exist in __init__ but are unused in forward -> omitted.
    """
    ks = jax.random.split(key, 11)

    def lin_w(k, fan_in, fan_out):
        bound = 1.0 / jnp.sqrt(fan_in)
        return jax.random.uniform(k, (fan_in, fan_out), jnp.float32, -bound, bound)

    def lin_b(k, fan_in, fan_out):
        bound = 1.0 / jnp.sqrt(fan_in)
        return jax.random.uniform(k, (1, fan_out), jnp.float32, -bound, bound)

    return {
        "w_in":  lin_w(ks[0], d0 + d1, hidden),
        "w11":   lin_w(ks[1], hidden, hidden), "b11": lin_b(ks[2], hidden, hidden),
        "w12":   lin_w(ks[3], hidden, hidden), "b12": lin_b(ks[4], hidden, hidden),
        "w21":   lin_w(ks[5], hidden, hidden), "b21": lin_b(ks[6], hidden, hidden),
        "w22":   lin_w(ks[7], hidden, hidden), "b22": lin_b(ks[8], hidden, hidden),
        "w_out": lin_w(ks[9], hidden, d0),
    }


def pack_params(p, d0, d1, hidden, dtype=jnp.bfloat16):
    """Pack all params into a lane-aligned [7, P, P] slab (P >= 128)."""
    din = d0 + d1
    P = _round_up(max(din, hidden, d0, 128), 128)

    slab = jnp.zeros((7, P, P), jnp.float32)
    slab = slab.at[0, 0:din, 0:hidden].set(p["w_in"])
    for i, tag in enumerate(("11", "12", "21", "22")):
        slab = slab.at[1 + i, 0:hidden, 0:hidden].set(p["w" + tag])
        slab = slab.at[6, i, 0:hidden].set(p["b" + tag].reshape(-1))
    slab = slab.at[5, 0:hidden, 0:d0].set(p["w_out"])
    return slab.astype(dtype)


# ----------------------------------------------------------------------------
# References
# ----------------------------------------------------------------------------
def reference_forward_f32(x, y, p):
    X = jnp.concatenate((x, y), axis=1) @ p["w_in"]
    h = jnp.maximum(X @ p["w11"] + p["b11"], 0.0)
    h = jnp.maximum(h @ p["w12"] + p["b12"], 0.0) + X
    h = jnp.maximum(h @ p["w21"] + p["b21"], 0.0)
    h = jnp.maximum(h @ p["w22"] + p["b22"], 0.0) + X
    return h @ p["w_out"]


def reference_forward_bf16(x, y, p, d0):
    """Mirrors the kernel's bf16-input / f32-accumulate arithmetic."""
    bf, f32 = jnp.bfloat16, jnp.float32

    def dt(a, w):
        return jnp.dot(a.astype(bf), w.astype(bf), preferred_element_type=f32)

    def b(name):
        return p[name].astype(bf).astype(f32)

    xy = jnp.concatenate((x, y), axis=1)
    X = dt(xy, p["w_in"])
    h = jnp.maximum(dt(X, p["w11"]) + b("b11"), 0.0)
    h = jnp.maximum(dt(h, p["w12"]) + b("b12"), 0.0) + X
    h = jnp.maximum(dt(h, p["w21"]) + b("b21"), 0.0)
    h = jnp.maximum(dt(h, p["w22"]) + b("b22"), 0.0) + X
    return dt(h, p["w_out"])


# ----------------------------------------------------------------------------
# Main
# ----------------------------------------------------------------------------
if __name__ == "__main__":
    # input_dim = (16, 16), hidden_dim = 32, batch = 8
    d0, d1, hidden, B = 16, 16, 32, 8

    key = jax.random.PRNGKey(0)
    k_x, k_y, k_p, k_x2, k_y2 = jax.random.split(key, 5)

    x = jax.random.normal(k_x, (B, d0), jnp.float32)
    y = jax.random.normal(k_y, (B, d1), jnp.float32)
    params = init_params(k_p, d0, d1, hidden)
    w_slab = pack_params(params, d0, d1, hidden)

    out = t_neuralnet_forward(x, y, w_slab, d0=d0, d1=d1)
    out = jax.block_until_ready(out)
    assert out.shape == (B, d0)

    # Tight check vs. a reference that uses the same bf16-in / f32-acc math.
    ref_bf16 = reference_forward_bf16(x, y, params, d0)
    assert jnp.allclose(out, ref_bf16, atol=5e-3, rtol=5e-3)

    # Loose check vs. the full-f32 PyTorch-equivalent reference (bf16 weights).
    ref_f32 = reference_forward_f32(x, y, params)
    assert jnp.allclose(out, ref_f32, atol=1e-1, rtol=1e-1)

    # Larger, non-divisible batch: exercises batch padding + multi-step
    # ("parallel") grid path.
    B2 = 500
    x2 = jax.random.normal(k_x2, (B2, d0), jnp.float32)
    y2 = jax.random.normal(k_y2, (B2, d1), jnp.float32)
    out2 = jax.block_until_ready(
        t_neuralnet_forward(x2, y2, w_slab, d0=d0, d1=d1, max_tile=256))
    ref2 = reference_forward_bf16(x2, y2, params, d0)
    assert out2.shape == (B2, d0)
    assert jnp.allclose(out2, ref2, atol=5e-3, rtol=5e-3)

    print("KERNEL_OK")
</pallas_src>

<mosaic_0001>
module attributes {stable_mosaic.version = 11 : i64} {
  func.func @t_neuralnet_kernel(%arg0: i32, %arg1: memref<8x128xbf16, #tpu.memory_space<vmem>>, %arg2: memref<7x128x128xbf16, #tpu.memory_space<vmem>>, %arg3: memref<8x128xf32, #tpu.memory_space<vmem>>) attributes {dimension_semantics = [#tpu.dimension_semantics<parallel>], iteration_bounds = array<i64: 1>, scalar_prefetch = 0 : i64, scratch_operands = 0 : i64, tpu.core_type = #tpu.core_type<tc>, window_params = [{transform_indices = @transform_0, window_bounds = array<i64: 8, 128>}, {pipeline_mode = #tpu.pipeline_mode<synchronous>, transform_indices = @transform_1, window_bounds = array<i64: 7, 128, 128>}, {transform_indices = @transform_2, window_bounds = array<i64: 8, 128>}]} {
    %c0 = arith.constant 0 : index
    %c0_0 = arith.constant 0 : index
    %0 = vector.load %arg1[%c0, %c0_0] : memref<8x128xbf16, #tpu.memory_space<vmem>>, vector<8x128xbf16>
    %c6 = arith.constant 6 : index
    %c0_1 = arith.constant 0 : index
    %c0_2 = arith.constant 0 : index
    %1 = vector.load %arg2[%c6, %c0_1, %c0_2] : memref<7x128x128xbf16, #tpu.memory_space<vmem>>, vector<1x16x128xbf16>
    %2 = vector.shape_cast %1 : vector<1x16x128xbf16> to vector<16x128xbf16>
    %3 = arith.extf %2 : vector<16x128xbf16> to vector<16x128xf32>
    %c0_3 = arith.constant 0 : index
    %c0_4 = arith.constant 0 : index
    %c0_5 = arith.constant 0 : index
    %4 = vector.load %arg2[%c0_3, %c0_4, %c0_5] : memref<7x128x128xbf16, #tpu.memory_space<vmem>>, vector<1x128x128xbf16>
    %5 = vector.shape_cast %4 : vector<1x128x128xbf16> to vector<128x128xbf16>
    %cst = arith.constant dense<0.000000e+00> : vector<8x128xf32>
    %6 = tpu.matmul %0, %5, %cst {dimension_numbers = #tpu.dot_dimension_numbers<[1], [0], [0], [1], [0, 0, 1, 1], [], []>} : vector<8x128xbf16>, vector<128x128xbf16>, vector<8x128xf32> -> vector<8x128xf32>
    %7 = arith.truncf %6 : vector<8x128xf32> to vector<8x128xbf16>
    %c1 = arith.constant 1 : index
    %c0_6 = arith.constant 0 : index
    %c0_7 = arith.constant 0 : index
    %8 = vector.load %arg2[%c1, %c0_6, %c0_7] : memref<7x128x128xbf16, #tpu.memory_space<vmem>>, vector<1x128x128xbf16>
    %9 = vector.shape_cast %8 : vector<1x128x128xbf16> to vector<128x128xbf16>
    %cst_8 = arith.constant dense<0.000000e+00> : vector<8x128xf32>
    %10 = tpu.matmul %7, %9, %cst_8 {dimension_numbers = #tpu.dot_dimension_numbers<[1], [0], [0], [1], [0, 0, 1, 1], [], []>} : vector<8x128xbf16>, vector<128x128xbf16>, vector<8x128xf32> -> vector<8x128xf32>
    %11 = vector.extract_strided_slice %3 {offsets = [0, 0], sizes = [1, 128], strides = [1, 1]} : vector<16x128xf32> to vector<1x128xf32>
    %12 = vector.broadcast %11 : vector<1x128xf32> to vector<8x128xf32>
    %13 = arith.addf %10, %12 : vector<8x128xf32>
    %cst_9 = arith.constant 0.000000e+00 : f32
    %14 = vector.broadcast %cst_9 : f32 to vector<8x128xf32>
    %15 = arith.maximumf %13, %14 : vector<8x128xf32>
    %16 = arith.truncf %15 : vector<8x128xf32> to vector<8x128xbf16>
    %c2 = arith.constant 2 : index
    %c0_10 = arith.constant 0 : index
    %c0_11 = arith.constant 0 : index
    %17 = vector.load %arg2[%c2, %c0_10, %c0_11] : memref<7x128x128xbf16, #tpu.memory_space<vmem>>, vector<1x128x128xbf16>
    %18 = vector.shape_cast %17 : vector<1x128x128xbf16> to vector<128x128xbf16>
    %cst_12 = arith.constant dense<0.000000e+00> : vector<8x128xf32>
    %19 = tpu.matmul %16, %18, %cst_12 {dimension_numbers = #tpu.dot_dimension_numbers<[1], [0], [0], [1], [0, 0, 1, 1], [], []>} : vector<8x128xbf16>, vector<128x128xbf16>, vector<8x128xf32> -> vector<8x128xf32>
    %20 = vector.extract_strided_slice %3 {offsets = [1, 0], sizes = [1, 128], strides = [1, 1]} : vector<16x128xf32> to vector<1x128xf32>
    %21 = vector.broadcast %20 : vector<1x128xf32> to vector<8x128xf32>
    %22 = arith.addf %19, %21 : vector<8x128xf32>
    %cst_13 = arith.constant 0.000000e+00 : f32
    %23 = vector.broadcast %cst_13 : f32 to vector<8x128xf32>
    %24 = arith.maximumf %22, %23 : vector<8x128xf32>
    %25 = arith.addf %24, %6 : vector<8x128xf32>
    %26 = arith.truncf %25 : vector<8x128xf32> to vector<8x128xbf16>
    %c3 = arith.constant 3 : index
    %c0_14 = arith.constant 0 : index
    %c0_15 = arith.constant 0 : index
    %27 = vector.load %arg2[%c3, %c0_14, %c0_15] : memref<7x128x128xbf16, #tpu.memory_space<vmem>>, vector<1x128x128xbf16>
    %28 = vector.shape_cast %27 : vector<1x128x128xbf16> to vector<128x128xbf16>
    %cst_16 = arith.constant dense<0.000000e+00> : vector<8x128xf32>
    %29 = tpu.matmul %26, %28, %cst_16 {dimension_numbers = #tpu.dot_dimension_numbers<[1], [0], [0], [1], [0, 0, 1, 1], [], []>} : vector<8x128xbf16>, vector<128x128xbf16>, vector<8x128xf32> -> vector<8x128xf32>
    %30 = vector.extract_strided_slice %3 {offsets = [2, 0], sizes = [1, 128], strides = [1, 1]} : vector<16x128xf32> to vector<1x128xf32>
    %31 = vector.broadcast %30 : vector<1x128xf32> to vector<8x128xf32>
    %32 = arith.addf %29, %31 : vector<8x128xf32>
    %cst_17 = arith.constant 0.000000e+00 : f32
    %33 = vector.broadcast %cst_17 : f32 to vector<8x128xf32>
    %34 = arith.maximumf %32, %33 : vector<8x128xf32>
    %35 = arith.truncf %34 : vector<8x128xf32> to vector<8x128xbf16>
    %c4 = arith.constant 4 : index
    %c0_18 = arith.constant 0 : index
    %c0_19 = arith.constant 0 : index
    %36 = vector.load %arg2[%c4, %c0_18, %c0_19] : memref<7x128x128xbf16, #tpu.memory_space<vmem>>, vector<1x128x128xbf16>
    %37 = vector.shape_cast %36 : vector<1x128x128xbf16> to vector<128x128xbf16>
    %cst_20 = arith.constant dense<0.000000e+00> : vector<8x128xf32>
    %38 = tpu.matmul %35, %37, %cst_20 {dimension_numbers = #tpu.dot_dimension_numbers<[1], [0], [0], [1], [0, 0, 1, 1], [], []>} : vector<8x128xbf16>, vector<128x128xbf16>, vector<8x128xf32> -> vector<8x128xf32>
    %39 = vector.extract_strided_slice %3 {offsets = [3, 0], sizes = [1, 128], strides = [1, 1]} : vector<16x128xf32> to vector<1x128xf32>
    %40 = vector.broadcast %39 : vector<1x128xf32> to vector<8x128xf32>
    %41 = arith.addf %38, %40 : vector<8x128xf32>
    %cst_21 = arith.constant 0.000000e+00 : f32
    %42 = vector.broadcast %cst_21 : f32 to vector<8x128xf32>
    %43 = arith.maximumf %41, %42 : vector<8x128xf32>
    %44 = arith.addf %43, %6 : vector<8x128xf32>
    %45 = arith.truncf %44 : vector<8x128xf32> to vector<8x128xbf16>
    %c5 = arith.constant 5 : index
    %c0_22 = arith.constant 0 : index
    %c0_23 = arith.constant 0 : index
    %46 = vector.load %arg2[%c5, %c0_22, %c0_23] : memref<7x128x128xbf16, #tpu.memory_space<vmem>>, vector<1x128x128xbf16>
    %47 = vector.shape_cast %46 : vector<1x128x128xbf16> to vector<128x128xbf16>
    %cst_24 = arith.constant dense<0.000000e+00> : vector<8x128xf32>
    %48 = tpu.matmul %45, %47, %cst_24 {dimension_numbers = #tpu.dot_dimension_numbers<[1], [0], [0], [1], [0, 0, 1, 1], [], []>} : vector<8x128xbf16>, vector<128x128xbf16>, vector<8x128xf32> -> vector<8x128xf32>
    %c0_25 = arith.constant 0 : index
    %c0_26 = arith.constant 0 : index
    %49 = vector.load %arg3[%c0_25, %c0_26] : memref<8x128xf32, #tpu.memory_space<vmem>>, vector<8x128xf32>
    tpu.vector_store %arg3[%c0_25, %c0_26], %48 {strides = array<i32>} : memref<8x128xf32, #tpu.memory_space<vmem>>, vector<8x128xf32>,
    return
  }
  func.func @transform_0(%arg0: i32) -> (i32, i32) {
    %c0_i32 = arith.constant 0 : i32
    %c0_i32_0 = arith.constant 0 : i32
    return %arg0, %c0_i32 : i32, i32
  }
  func.func @transform_1(%arg0: i32) -> (i32, i32, i32) {
    %c0_i32 = arith.constant 0 : i32
    %c0_i32_0 = arith.constant 0 : i32
    %c0_i32_1 = arith.constant 0 : i32
    %c0_i32_2 = arith.constant 0 : i32
    return %c0_i32, %c0_i32_0, %c0_i32_1 : i32, i32, i32
  }
  func.func @transform_2(%arg0: i32) -> (i32, i32) {
    %c0_i32 = arith.constant 0 : i32
    %c0_i32_0 = arith.constant 0 : i32
    return %arg0, %c0_i32 : i32, i32
  }
}

</mosaic_0001>

<bundles_post_ra>
// kernel: tpu_custom_call.1
= control target key start
LH: loop header
LB: loop body
LE: loop exit
PB: predicated region body
PF: predicated region fallthrough
CT: control target
= control target key end

     0   :  { %7 = vsyncpa [#allocation3], 0  ;;  %s1208_s0 = inlined_call_operand.hbm [shape: bf16[8,128], index: 0, kind: input, shape index: {}]   ;;  %s1209_s1 = inlined_call_operand.hbm [shape: bf16[7,128,128], index: 1, kind: input, shape index: {}]   ;;  %s1210_s2 = inlined_call_operand.hbm [shape: f32[8,128], index: 2, kind: output, shape index: {}]  }
   0x1   :  { %8 = vsyncpa [#allocation6], 0 }
   0x2   :  { %9 = vsyncpa [#allocation4], 0  ;;  %s1065_s9 = smov [#allocation2]   ;;  %s1066_s11 = smov [#allocation5]  }
   0x3   :  { %s16_s10 = sshll.u32 %s1065_s9, 4  ;;  %s25_s12 = sshll.u32 %s1066_s11, 4  ;;  %s17_s10 = int_to_ptr.vmem [resolvable:$true] %s16_s10  ;;  %s1087_s12 = int_to_ptr.vmem [resolvable:$true] %s25_s12 }
   0x4   :  { %s993_s15 = scalar_lea.hbm %s1208_s0, 64 }
   0x5   :  { %p994_p0 = scmp.ne.s32.totalorder %s1208_s0, %s993_s15  ;;  %p997_p1 = scmp.lt.u32.totalorder %s993_s15, %s1208_s0 }
   0x7   :  { %p999_p2 = pnand %p997_p1, %p994_p0 }
   0x9   :  { %1002 = shalt.err (!%p999_p2)
}
   0xa   :  { %s1003_s20 = scalar_lea.vmem %s17_s10, 64  ;;  %p1008_p4 = scmp.lt.s32.totalorder %s17_s10, %s17_s10 }
   0xb   :  { %p1004_p3 = scmp.ne.s32.totalorder %s17_s10, %s1003_s20  ;;  %p1009_p5 = scmp.lt.s32.totalorder %s1003_s20, %s1003_s20 }
   0xd   :  { %p1010_p6 = por %p1009_p5, %p1008_p4 }
   0xf   :  { %p1011_p7 = pnand %p1010_p6, %p1004_p3 }
  0x11   :  { %1014 = shalt.err (!%p1011_p7)
}
  0x12   :  { %19 = dma.hbm_to_vmem [thread:$0]  %s1208_s0, 64, %s17_s10, [#allocation3]  }
  0x13   :  { %s1015_s25 = scalar_lea.hbm %s1209_s1, 7168 }
  0x14   :  { %p1016_p8 = scmp.ne.s32.totalorder %s1209_s1, %s1015_s25  ;;  %p1019_p9 = scmp.lt.u32.totalorder %s1015_s25, %s1209_s1 }
  0x16   :  { %p1021_p10 = pnand %p1019_p9, %p1016_p8 }
  0x18   :  { %1024 = shalt.err (!%p1021_p10)
}
  0x19   :  { %s1025_s30 = scalar_lea.vmem %s1087_s12, 7168  ;;  %p1030_p12 = scmp.lt.s32.totalorder %s1087_s12, %s1087_s12 }
  0x1a   :  { %p1026_p11 = scmp.ne.s32.totalorder %s1087_s12, %s1025_s30  ;;  %p1031_p13 = scmp.lt.s32.totalorder %s1025_s30, %s1025_s30 }
  0x1c   :  { %p1032_p0 = por %p1031_p13, %p1030_p12 }
  0x1e   :  { %p1033_p1 = pnand %p1032_p0, %p1026_p11 }
  0x20   :  { %1036 = shalt.err (!%p1033_p1)
}
  0x21   :  { %s1067_s0 = smov 64   ;;  %s1068_s3 = smov 4  }
  0x22   :  { %31 = dma.hbm_to_vmem [thread:$0]  %s1209_s1, 7168, %s1087_s12, [#allocation6], %s1067_s0, %s1067_s0, %s1068_s3  }
  0x23   :  { %1059 = dma.done.wait [#allocation3], 64  }
  0x24   :  { %1060 = vsyncadd [#allocation3], 4294967232 }
  0x25   :  { %1061 = dma.done.wait [#allocation6], 7168  }
  0x26   :  { %1062 = vsyncadd [#allocation6], 4294960128  ;;  %v1069_v0 = vmov 0.0   ;;  %vm1070_vm0 = vmmov 0   ;;  %v945_v1 = vld [vmem:[#allocation5] sm:$0xff]   ;;  %v946_v2 = vld [vmem:[#allocation5 + $0x8] sm:$0xff]   ;;  %v165_v37 = vlaneseq }
  0x27   :  { %818 = vmatprep.subr.bf16.mxu0 %v1069_v0  ;;  %834 = vmatprep.mubr.msk.bf16.mxu0 %vm1070_vm0, %v1069_v0  ;;  %v947_v3 = vld [vmem:[#allocation5 + $0x10] sm:$0xff]   ;;  %v953_v4 = vld [vmem:[#allocation5 + $0x40] sm:$0xff]   ;;  %v948_v5 = vld [vmem:[#allocation5 + $0x18] sm:$0xff]   ;;  %s1071_s1 = smov [#allocation7]  }
  0x28   :  { %838 = vmatprep.subr.bf16.mxu1 %v1069_v0  ;;  %854 = vmatprep.mubr.msk.bf16.mxu1 %vm1070_vm0, %v1069_v0  ;;  %v954_v6 = vld [vmem:[#allocation5 + $0x48] sm:$0xff]   ;;  %v949_v7 = vld [vmem:[#allocation5 + $0x20] sm:$0xff]   ;;  %v955_v8 = vld [vmem:[#allocation5 + $0x50] sm:$0xff]   ;;  %v1162_v38 = vshrl.u32 %v165_v37, 7  ;;  %s706_s6 = sshll.u32 %s1071_s1, 4  ;;  %s707_s6 = int_to_ptr.vmem [resolvable:$true] %s706_s6 }
  0x29   :  { %819 = vmatpush3.bf16.msra.mxu0 %v945_v1  ;;  %839 = vmatpush3.bf16.msra.mxu1 %v953_v4  ;;  %v950_v9 = vld [vmem:[#allocation5 + $0x28] sm:$0xff]   ;;  %v956_v10 = vld [vmem:[#allocation5 + $0x58] sm:$0xff]   ;;  %v951_v11 = vld [vmem:[#allocation5 + $0x30] sm:$0xff]   ;;  %s1037_s7 = scalar_lea.vmem %s707_s6, 128  ;;  %p1042_p3 = scmp.lt.s32.totalorder %s707_s6, %s707_s6 }
  0x2a   :  { %820 = vmatprep.subr.bf16.mxu0 %v1069_v0  ;;  %840 = vmatprep.subr.bf16.mxu1 %v1069_v0  ;;  %v957_v12 = vld [vmem:[#allocation5 + $0x60] sm:$0xff]   ;;  %v952_v13 = vld [vmem:[#allocation5 + $0x38] sm:$0xff]   ;;  %v958_v14 = vld [vmem:[#allocation5 + $0x68] sm:$0xff]   ;;  %v167_v41 = vsub.s32 0, %v1162_v38  ;;  %v278_v58 = vsub.s32 1, %v1162_v38  ;;  %p1038_p2 = scmp.ne.s32.totalorder %s707_s6, %s1037_s7  ;;  %p1043_p4 = scmp.lt.s32.totalorder %s1037_s7, %s1037_s7 }
  0x2b   :  { %v39_v15 = vld [vmem:[#allocation2] sm:$0xf]  ;;  %v959_v16 = vld [vmem:[#allocation5 + $0x70] sm:$0xff]   ;;  %v961_v18 = vld [vmem:[#allocation5 + $0x80] sm:$0xff]  }
  0x2c   :  { %v960_v17 = vld [vmem:[#allocation5 + $0x78] sm:$0xff]   ;;  %v962_v19 = vld [vmem:[#allocation5 + $0x88] sm:$0xff]   ;;  %v963_v20 = vld [vmem:[#allocation5 + $0x90] sm:$0xff]   ;;  %p1044_p5 = por %p1043_p4, %p1042_p3 }
  0x2d   :  { %821 = vmatpush3.bf16.msra.mxu0 %v946_v2  ;;  %841 = vmatpush3.bf16.msra.mxu1 %v954_v6  ;;  %v964_v21 = vld [vmem:[#allocation5 + $0x98] sm:$0xff]   ;;  %v965_v22 = vld [vmem:[#allocation5 + $0xa0] sm:$0xff]   ;;  %v966_v23 = vld [vmem:[#allocation5 + $0xa8] sm:$0xff]  }
  0x2e   :  { %822 = vmatprep.subr.bf16.mxu0 %v1069_v0  ;;  %842 = vmatprep.subr.bf16.mxu1 %v1069_v0  ;;  %v967_v29 = vld [vmem:[#allocation5 + $0xb0] sm:$0xff]   ;;  %v968_v30 = vld [vmem:[#allocation5 + $0xb8] sm:$0xff]   ;;  %v969_v31 = vld [vmem:[#allocation5 + $0xc0] sm:$0xff]   ;;  %p1045_p6 = pnand %p1044_p5, %p1038_p2 }
  0x2f   :  { %v970_v32 = vld [vmem:[#allocation5 + $0xc8] sm:$0xff]   ;;  %v971_v33 = vld [vmem:[#allocation5 + $0xd0] sm:$0xff]   ;;  %v972_v34 = vld [vmem:[#allocation5 + $0xd8] sm:$0xff]  }
  0x30   :  { %v973_v35 = vld [vmem:[#allocation5 + $0xe0] sm:$0xff]   ;;  %v974_v36 = vld [vmem:[#allocation5 + $0xe8] sm:$0xff]   ;;  %v975_v50 = vld [vmem:[#allocation5 + $0xf0] sm:$0xff]  }
  0x31   :  { %823 = vmatpush3.bf16.msra.mxu0 %v947_v3  ;;  %843 = vmatpush3.bf16.msra.mxu1 %v955_v8  ;;  %v41_v39 = vld [vmem:[#allocation5 + $0x180] sm:$0xf]  ;;  %v976_v51 = vld [vmem:[#allocation5 + $0xf8] sm:$0xff]   ;;  %v978_v53 = vld [vmem:[#allocation5 + $0x108] sm:$0xff]  }
  0x32   :  { %824 = vmatprep.subr.bf16.mxu0 %v1069_v0  ;;  %844 = vmatprep.subr.bf16.mxu1 %v1069_v0  ;;  %v1164_v40 = vunpack.c.l.bf16 %v41_v39  ;;  %v977_v52 = vld [vmem:[#allocation5 + $0x100] sm:$0xff]   ;;  %v979_v54 = vld [vmem:[#allocation5 + $0x110] sm:$0xff]   ;;  %v980_v55 = vld [vmem:[#allocation5 + $0x118] sm:$0xff]  }
  0x33   :  { %v981_v56 = vld [vmem:[#allocation5 + $0x120] sm:$0xff]   ;;  %v982_v57 = vld [vmem:[#allocation5 + $0x128] sm:$0xff]   ;;  %v984_v6 = vld [vmem:[#allocation5 + $0x138] sm:$0xff]  }
  0x34   :  { %v168_v42 = vrot.slane %v1164_v40, %v167_v41  ;;  %v279_v59 = vrot.slane %v1164_v40, %v278_v58  ;;  %v986_v8 = vld [vmem:[#allocation5 + $0x148] sm:$0xff]  }
  0x35   :  { %825 = vmatpush3.bf16.msra.mxu0 %v948_v5  ;;  %845 = vmatpush3.bf16.msra.mxu1 %v956_v10  ;;  %v983_v5 = vld [vmem:[#allocation5 + $0x130] sm:$0xff]   ;;  %v988_v10 = vld [vmem:[#allocation5 + $0x158] sm:$0xff]  }
  0x36   :  { %826 = vmatprep.subr.bf16.mxu0 %v1069_v0  ;;  %846 = vmatprep.subr.bf16.mxu1 %v1069_v0 }
  0x39   :  { %827 = vmatpush3.bf16.msra.mxu0 %v949_v7  ;;  %847 = vmatpush3.bf16.msra.mxu1 %v957_v12  ;;  %v985_v7 = vld [vmem:[#allocation5 + $0x140] sm:$0xff]   ;;  %v990_v12 = vld [vmem:[#allocation5 + $0x168] sm:$0xff]  }
  0x3a   :  { %828 = vmatprep.subr.bf16.mxu0 %v1069_v0  ;;  %848 = vmatprep.subr.bf16.mxu1 %v1069_v0 }
  0x3d   :  { %829 = vmatpush3.bf16.msra.mxu0 %v950_v9  ;;  %849 = vmatpush3.bf16.msra.mxu1 %v958_v14  ;;  %v987_v9 = vld [vmem:[#allocation5 + $0x150] sm:$0xff]  }
  0x3e   :  { %830 = vmatprep.subr.bf16.mxu0 %v1069_v0  ;;  %850 = vmatprep.subr.bf16.mxu1 %v1069_v0 }
  0x41   :  { %831 = vmatpush3.bf16.msra.mxu0 %v951_v11  ;;  %851 = vmatpush3.bf16.msra.mxu1 %v959_v16  ;;  %v989_v11 = vld [vmem:[#allocation5 + $0x160] sm:$0xff]  }
  0x42   :  { %832 = vmatprep.subr.bf16.mxu0 %v1069_v0  ;;  %852 = vmatprep.subr.bf16.mxu1 %v1069_v0 }
  0x45   :  { %833 = vmatpush3.bf16.msra.mxu0 %v952_v13  ;;  %853 = vmatpush3.bf16.msra.mxu1 %v960_v17  ;;  %v390_v13 = vsub.s32 2, %v1162_v38 }
  0x46   :  { %858 = vmatprep.subr.bf16.mxu0 %v1069_v0  ;;  %878 = vmatprep.subr.bf16.mxu1 %v1069_v0 }
  0x47   :  { %v391_v14 = vrot.slane %v1164_v40, %v390_v13 }
  0x48   :  { %835 = vmatmul.mubr.bf16.vlgmr.msra.gmra.mrb[0].mxu0 %v39_v15 }
  0x49   :  { %874 = vmatprep.mubr.msk.bf16.mxu0 %vm1070_vm0, %v1069_v0  ;;  %859 = vmatpush3.bf16.msra.mxu0 %v961_v18 }
  0x4a   :  { %860 = vmatprep.subr.bf16.mxu0 %v1069_v0 }
  0x4d   :  { %861 = vmatpush3.bf16.msra.mxu0 %v962_v19 }
  0x4e   :  { %862 = vmatprep.subr.bf16.mxu0 %v1069_v0 }
  0x51   :  { %863 = vmatpush3.bf16.msra.mxu0 %v963_v20 }
  0x52   :  { %864 = vmatprep.subr.bf16.mxu0 %v1069_v0 }
  0x55   :  { %865 = vmatpush3.bf16.msra.mxu0 %v964_v21 }
  0x56   :  { %866 = vmatprep.subr.bf16.mxu0 %v1069_v0 }
  0x59   :  { %867 = vmatpush3.bf16.msra.mxu0 %v965_v22  ;;  %v991_v22 = vld [vmem:[#allocation5 + $0x170] sm:$0xff]  }
  0x5a   :  { %868 = vmatprep.subr.bf16.mxu0 %v1069_v0 }
  0x5d   :  { %869 = vmatpush3.bf16.msra.mxu0 %v966_v23  ;;  %v992_v23 = vld [vmem:[#allocation5 + $0x178] sm:$0xff]  }
  0x5e   :  { %870 = vmatprep.subr.bf16.mxu0 %v1069_v0 }
  0x61   :  { %871 = vmatpush3.bf16.msra.mxu0 %v967_v29 }
  0x62   :  { %872 = vmatprep.subr.bf16.mxu0 %v1069_v0 }
  0x65   :  { %873 = vmatpush3.bf16.msra.mxu0 %v968_v30 }
  0x66   :  { %898 = vmatprep.subr.bf16.mxu0 %v1069_v0 }
 0x11b   :  { %v1148_v24 = vpop.f32.mrb[0].mxu0 }
 0x11c   :  { %v147_v25 = vpack.c.bf16 %v1148_v24, %v1148_v24  ;;  %v836_v26 = vpop.f32.mrb[1].mxu0 }
 0x11d   :  { %v144_v27 = vpop.f32.mrb[2].mxu0 }
 0x11e   :  { %v837_v28 = vpop.f32.mrb[3].mxu0  ;;  %855 = vmatmul.mubr.bf16.vlgmr.msra.gmra.mrb[0].mxu1 %v147_v25  ;;  %v501_v25 = vsub.s32 3, %v1162_v38 }
 0x11f   :  { %894 = vmatprep.mubr.msk.bf16.mxu1 %vm1070_vm0, %v1069_v0  ;;  %879 = vmatpush3.bf16.msra.mxu1 %v969_v31 }
 0x120   :  { %880 = vmatprep.subr.bf16.mxu1 %v1069_v0  ;;  %v502_v26 = vrot.slane %v1164_v40, %v501_v25 }
 0x123   :  { %881 = vmatpush3.bf16.msra.mxu1 %v970_v32 }
 0x124   :  { %882 = vmatprep.subr.bf16.mxu1 %v1069_v0 }
 0x127   :  { %883 = vmatpush3.bf16.msra.mxu1 %v971_v33 }
 0x128   :  { %884 = vmatprep.subr.bf16.mxu1 %v1069_v0 }
 0x12b   :  { %885 = vmatpush3.bf16.msra.mxu1 %v972_v34 }
 0x12c   :  { %886 = vmatprep.subr.bf16.mxu1 %v1069_v0 }
 0x12f   :  { %887 = vmatpush3.bf16.msra.mxu1 %v973_v35 }
 0x130   :  { %888 = vmatprep.subr.bf16.mxu1 %v1069_v0 }
 0x133   :  { %889 = vmatpush3.bf16.msra.mxu1 %v974_v36 }
 0x134   :  { %890 = vmatprep.subr.bf16.mxu1 %v1069_v0 }
 0x137   :  { %891 = vmatpush3.bf16.msra.mxu1 %v975_v50 }
 0x138   :  { %892 = vmatprep.subr.bf16.mxu1 %v1069_v0 }
 0x13b   :  { %893 = vmatpush3.bf16.msra.mxu1 %v976_v51 }
 0x13c   :  { %918 = vmatprep.subr.bf16.mxu1 %v1069_v0 }
 0x1f1   :  { %v251_v43 = vpop.f32.mrb[0].mxu1 }
 0x1f2   :  { %v252_v44 = vadd.f32 %v251_v43, %v168_v42  ;;  %v856_v45 = vpop.f32.mrb[1].mxu1 }
 0x1f3   :  { %v254_v46 = vpop.f32.mrb[2].mxu1 }
 0x1f4   :  { %v257_v47 = vmax.f32 %v252_v44, 0.0  ;;  %v857_v48 = vpop.f32.mrb[3].mxu1 }
 0x1f6   :  { %v258_v49 = vpack.c.bf16 %v257_v47, %v257_v47 }
 0x1f8   :  { %875 = vmatmul.mubr.bf16.vlgmr.msra.gmra.mrb[4].mxu0 %v258_v49 }
 0x1f9   :  { %914 = vmatprep.mubr.msk.bf16.mxu0 %vm1070_vm0, %v1069_v0  ;;  %899 = vmatpush3.bf16.msra.mxu0 %v977_v52 }
 0x1fa   :  { %900 = vmatprep.subr.bf16.mxu0 %v1069_v0 }
 0x1fd   :  { %901 = vmatpush3.bf16.msra.mxu0 %v978_v53 }
 0x1fe   :  { %902 = vmatprep.subr.bf16.mxu0 %v1069_v0 }
 0x201   :  { %903 = vmatpush3.bf16.msra.mxu0 %v979_v54 }
 0x202   :  { %904 = vmatprep.subr.bf16.mxu0 %v1069_v0 }
 0x205   :  { %905 = vmatpush3.bf16.msra.mxu0 %v980_v55 }
 0x206   :  { %906 = vmatprep.subr.bf16.mxu0 %v1069_v0 }
 0x209   :  { %907 = vmatpush3.bf16.msra.mxu0 %v981_v56 }
 0x20a   :  { %908 = vmatprep.subr.bf16.mxu0 %v1069_v0 }
 0x20d   :  { %909 = vmatpush3.bf16.msra.mxu0 %v982_v57 }
 0x20e   :  { %910 = vmatprep.subr.bf16.mxu0 %v1069_v0 }
 0x211   :  { %911 = vmatpush3.bf16.msra.mxu0 %v983_v5 }
 0x212   :  { %912 = vmatprep.subr.bf16.mxu0 %v1069_v0 }
 0x215   :  { %913 = vmatpush3.bf16.msra.mxu0 %v984_v6 }
 0x2cb   :  { %v362_v60 = vpop.f32.mrb[4].mxu0 }
 0x2cc   :  { %v363_v61 = vadd.f32 %v362_v60, %v279_v59  ;;  %v876_v62 = vpop.f32.mrb[5].mxu0 }
 0x2cd   :  { %v365_v63 = vpop.f32.mrb[6].mxu0 }
 0x2ce   :  { %v368_v1 = vmax.f32 %v363_v61, 0.0  ;;  %v877_v2 = vpop.f32.mrb[7].mxu0 }
 0x2d0   :  { %v369_v3 = vadd.f32 %v368_v1, %v1148_v24 }
 0x2d2   :  { %v370_v4 = vpack.c.bf16 %v369_v3, %v369_v3 }
 0x2d4   :  { %895 = vmatmul.mubr.bf16.vlgmr.msra.gmra.mrb[4].mxu1 %v370_v4 }
 0x2d5   :  { %934 = vmatprep.mubr.msk.bf16.mxu1 %vm1070_vm0, %v1069_v0  ;;  %919 = vmatpush3.bf16.msra.mxu1 %v985_v7 }
 0x2d6   :  { %920 = vmatprep.subr.bf16.mxu1 %v1069_v0 }
 0x2d9   :  { %921 = vmatpush3.bf16.msra.mxu1 %v986_v8 }
 0x2da   :  { %922 = vmatprep.subr.bf16.mxu1 %v1069_v0 }
 0x2dd   :  { %923 = vmatpush3.bf16.msra.mxu1 %v987_v9 }
 0x2de   :  { %924 = vmatprep.subr.bf16.mxu1 %v1069_v0 }
 0x2e1   :  { %925 = vmatpush3.bf16.msra.mxu1 %v988_v10 }
 0x2e2   :  { %926 = vmatprep.subr.bf16.mxu1 %v1069_v0 }
 0x2e5   :  { %927 = vmatpush3.bf16.msra.mxu1 %v989_v11 }
 0x2e6   :  { %928 = vmatprep.subr.bf16.mxu1 %v1069_v0 }
 0x2e9   :  { %929 = vmatpush3.bf16.msra.mxu1 %v990_v12 }
 0x2ea   :  { %930 = vmatprep.subr.bf16.mxu1 %v1069_v0 }
 0x2ed   :  { %931 = vmatpush3.bf16.msra.mxu1 %v991_v22 }
 0x2ee   :  { %932 = vmatprep.subr.bf16.mxu1 %v1069_v0 }
 0x2f1   :  { %933 = vmatpush3.bf16.msra.mxu1 %v992_v23 }
 0x3a7   :  { %v474_v15 = vpop.f32.mrb[4].mxu1 }
 0x3a8   :  { %v475_v16 = vadd.f32 %v474_v15, %v391_v14  ;;  %v896_v17 = vpop.f32.mrb[5].mxu1 }
 0x3a9   :  { %v477_v18 = vpop.f32.mrb[6].mxu1 }
 0x3aa   :  { %v480_v19 = vmax.f32 %v475_v16, 0.0  ;;  %v897_v20 = vpop.f32.mrb[7].mxu1 }
 0x3ac   :  { %v481_v21 = vpack.c.bf16 %v480_v19, %v480_v19 }
 0x3ae   :  { %915 = vmatmul.mubr.bf16.vlgmr.msra.gmra.mrb[8].mxu0 %v481_v21 }
 0x481   :  { %v585_v27 = vpop.f32.mrb[8].mxu0 }
 0x482   :  { %v586_v28 = vadd.f32 %v585_v27, %v502_v26  ;;  %v916_v29 = vpop.f32.mrb[9].mxu0 }
 0x483   :  { %v588_v30 = vpop.f32.mrb[10].mxu0 }
 0x484   :  { %v591_v31 = vmax.f32 %v586_v28, 0.0  ;;  %v917_v32 = vpop.f32.mrb[11].mxu0 }
 0x486   :  { %v592_v33 = vadd.f32 %v591_v31, %v1148_v24 }
 0x488   :  { %v593_v34 = vpack.c.bf16 %v592_v33, %v592_v33 }
 0x48a   :  { %935 = vmatmul.mubr.bf16.vlgmr.msra.gmra.mrb[8].mxu1 %v593_v34 }
 0x55d   :  { %v693_v0 = vpop.f32.mrb[8].mxu1 }
 0x55e   :  { %699 = vst [vmem:[#allocation7] sm:$0xff] %v693_v0  ;;  %v936_v35 = vpop.f32.mrb[9].mxu1 }
 0x55f   :  { %v696_v36 = vpop.f32.mrb[10].mxu1 }
 0x560   :  { %1048 = shalt.err (!%p1045_p6)
}
 0x561   :  { %s1049_s10 = scalar_lea.hbm %s1210_s2, 128 }
 0x562   :  { %p1050_p7 = scmp.ne.s32.totalorder %s1210_s2, %s1049_s10  ;;  %p1053_p8 = scmp.lt.u32.totalorder %s1049_s10, %s1210_s2 }
 0x564   :  { %p1055_p9 = pnand %p1053_p8, %p1050_p7 }
 0x566   :  { %1058 = shalt.err (!%p1055_p9)
}
 0x567   :  { %709 = dma.vmem_to_hbm [thread:$0]  %s707_s6, 128, %s1210_s2, [#allocation4]   ;;  %v937_v24 = vpop.f32.mrb[11].mxu1 }
 0x568   :  { %1063 = dma.done.wait [#allocation4], 128  }
 0x569   :  { %1064 = vsyncadd [#allocation4], 4294967168 }
 0x56a   :  { %713 = vsyncpa [#allocation3], 1 }
 0x56b   :  { %714 = vsyncpa [#allocation6], 1 }
 0x56c   :  { %715 = vsyncpa [#allocation4], 1 }

</bundles_post_ra>
